<compile_context>
chip_gen: v6e
topology: v6e:2x2x1
jax: 0.10.0
libtpu: 0.0.40
codegen_flags: <defaults>
</compile_context>

<pallas_src>
import jax
import jax.numpy as jnp
from jax.experimental import pallas as pl
from jax.experimental.pallas import tpu as pltpu


_TARGET_BLOCK_BYTES = 4 << 20     # ~4 MiB lane-dense blocks: ~85%+ of HBM roofline on v5e/v6e/v7x
_MAX_TM = 2048                    # keeps the lane-padded (tm,1) scale block <= 1 MiB per buffer


def _round_down_mult(n, m):
    return max((n // m) * m, m)


def _round_up_mult(n, m):
    return ((n + m - 1) // m) * m


def _pick_tiles(rows, s, itemsize):
    """Pick (tm, ts): tm a multiple of 8 (<= _MAX_TM); ts a multiple of 128 or the full lane extent."""
    if s % 128 == 0 and 8 * s * itemsize > _TARGET_BLOCK_BYTES:
        # Even a single 8-row slab is too big: tile the lane (H*W) axis as well.
        ts = min(_round_down_mult(_TARGET_BLOCK_BYTES // (8 * itemsize), 128), s)
        tm = 8
    else:
        # TODO(synk): for huge *odd* H*W (not a multiple of 128) we keep the full lane extent;
        # padding S up to 128 would avoid masked stores but costs an extra HBM pass.
        ts = s
        tm = _TARGET_BLOCK_BYTES // max(ts * itemsize, 1)
        tm = max(8, min(_round_down_mult(max(tm, 8), 8), _MAX_TM))
        tm = min(tm, _round_up_mult(rows, 8))      # don't allocate blocks bigger than the data
    return tm, ts


def _ca_scale_kernel(x_ref, s_ref, o_ref):
    """x:(tm, ts) slab of rows; s:(tm, 1) per-row attention scalar (f32); o:(tm, ts)."""
    o_ref[...] = (x_ref[...] * s_ref[...]).astype(o_ref.dtype)   # lane-broadcast multiply (VPU)


@jax.jit
def ca_layer(x, p, w1, w2):
    """
    x:  (2B, Cout, H, W)  NCHW feature map
    p:  (B, Cin)          conditioning vector
    w1: (Cin, Ch)         torch conv1 weight (Ch, Cin, 1, 1) squeezed + transposed
    w2: (Ch, Cout)        torch conv2 weight (Cout, Ch, 1, 1) squeezed + transposed
    returns: (2B, Cout, H, W)
    """
    b2, c_out, hh, ww = x.shape
    b, c_in = p.shape
    assert b2 == 2 * b, "x batch must be 2x p batch (forward concatenates att with itself)"
    c_hidden = w1.shape[1]
    assert w1.shape == (c_in, c_hidden) and w2.shape == (c_hidden, c_out)

    # ---- stage 1: attention MLP (a few KFLOPs) — plain XLA, kept in f32 ----------------------
    h = jnp.dot(p.astype(jnp.float32), w1.astype(jnp.float32))
    h = jnp.where(h > 0, h, 0.1 * h)                                   # LeakyReLU(0.1)
    att = jax.nn.sigmoid(jnp.dot(h, w2.astype(jnp.float32)))           # (B, Cout), f32

    # ---- stage 2: x * att — one streaming, lane-dense Pallas pass over x ---------------------
    rows = b * c_out
    s = hh * ww
    x3 = x.reshape(2, rows, s)            # free row-major view; axis 0 = duplicated batch halves
    scale = att.reshape(rows, 1)          # one f32 scalar per row; no concatenate materialized

    itemsize = jnp.dtype(x.dtype).itemsize
    tm, ts = _pick_tiles(rows, s, itemsize)
    nr = pl.cdiv(rows, tm)
    ns = pl.cdiv(s, ts)
    grid = (2, nr, ns)                    # leading dup axis guarantees >= 2 parallel grid steps

    # Explicit VMEM budget: double-buffered x-in + out blocks, plus the lane-padded (tm,1)
    # scale blocks (tm x 128 lanes x 4 B each, double-buffered).
    block_bytes = tm * ts * itemsize
    scale_block_bytes = tm * 128 * 4
    vmem_need = 2 * (2 * block_bytes) + 2 * scale_block_bytes + (1 << 20)
    vmem_limit = int(max(32 << 20, vmem_need + (4 << 20)))

    cost = pl.CostEstimate(
        flops=2 * rows * s,
        transcendentals=0,
        bytes_accessed=2 * (2 * rows * s) * itemsize + rows * 4,
    )

    out3 = pl.pallas_call(
        _ca_scale_kernel,
        out_shape=jax.ShapeDtypeStruct((2, rows, s), x.dtype),
        grid_spec=pltpu.PrefetchScalarGridSpec(
            num_scalar_prefetch=0,
            grid=grid,
            in_specs=[
                pl.BlockSpec((None, tm, ts), lambda d, i, j: (d, i, j)),
                pl.BlockSpec((tm, 1), lambda d, i, j: (i, 0)),
            ],
            out_specs=pl.BlockSpec((None, tm, ts), lambda d, i, j: (d, i, j)),
        ),
        compiler_params=pltpu.CompilerParams(
            dimension_semantics=("parallel", "parallel", "parallel"),
            vmem_limit_bytes=vmem_limit,
        ),
        cost_estimate=cost,
    )(x3, scale)

    return out3.reshape(b2, c_out, hh, ww)


def _reference(x, p, w1, w2):
    h = p.astype(jnp.float32) @ w1.astype(jnp.float32)
    h = jnp.where(h > 0, h, 0.1 * h)
    att = jax.nn.sigmoid(h @ w2.astype(jnp.float32))
    att2 = jnp.concatenate([att, att], axis=0)
    return (x * att2[:, :, None, None]).astype(x.dtype)


if __name__ == "__main__":
    # CA_layer(channels_in=32, channels_out=32, reduction=8); x: (2B, Cout, 16, 16), p: (B, Cin)
    b, c_in, c_out, reduction, hh, ww = 2, 32, 32, 8, 16, 16
    c_hidden = c_in // reduction

    key = jax.random.PRNGKey(0)
    kx, kp, k1, k2 = jax.random.split(key, 4)

    x = jax.random.normal(kx, (2 * b, c_out, hh, ww), dtype=jnp.float32)
    p = jax.random.normal(kp, (b, c_in), dtype=jnp.float32)
    # torch conv weights are (out, in, 1, 1); we store their squeezed transposes
    w1 = jax.random.normal(k1, (c_in, c_hidden), dtype=jnp.float32) * (1.0 / jnp.sqrt(c_in))
    w2 = jax.random.normal(k2, (c_hidden, c_out), dtype=jnp.float32) * (1.0 / jnp.sqrt(c_hidden))

    out = jax.block_until_ready(ca_layer(x, p, w1, w2))

    ref = _reference(x, p, w1, w2)
    assert out.shape == (2 * b, c_out, hh, ww), out.shape
    assert jnp.allclose(out, ref, atol=1e-5, rtol=1e-5), float(jnp.max(jnp.abs(out - ref)))

    print("KERNEL_OK")
</pallas_src>

<mosaic_0001>
module attributes {stable_mosaic.version = 11 : i64} {
  func.func @_ca_scale_kernel(%arg0: i32, %arg1: i32, %arg2: i32, %arg3: memref<1x64x256xf32, #tpu.memory_space<vmem>>, %arg4: memref<64x1xf32, #tpu.memory_space<vmem>>, %arg5: memref<1x64x256xf32, #tpu.memory_space<vmem>>) attributes {dimension_semantics = [#tpu.dimension_semantics<parallel>, #tpu.dimension_semantics<parallel>, #tpu.dimension_semantics<parallel>], iteration_bounds = array<i64: 2, 1, 1>, scalar_prefetch = 0 : i64, scratch_operands = 0 : i64, tpu.core_type = #tpu.core_type<tc>, window_params = [{transform_indices = @transform_0, window_bounds = array<i64: 1, 64, 256>}, {transform_indices = @transform_1, window_bounds = array<i64: 64, 1>}, {transform_indices = @transform_2, window_bounds = array<i64: 1, 64, 256>}]} {
    %c0 = arith.constant 0 : index
    %c0_0 = arith.constant 0 : index
    %c0_1 = arith.constant 0 : index
    %0 = vector.load %arg3[%c0, %c0_0, %c0_1] : memref<1x64x256xf32, #tpu.memory_space<vmem>>, vector<1x64x256xf32>
    %1 = vector.shape_cast %0 : vector<1x64x256xf32> to vector<64x256xf32>
    %c0_2 = arith.constant 0 : index
    %c0_3 = arith.constant 0 : index
    %2 = vector.load %arg4[%c0_2, %c0_3] : memref<64x1xf32, #tpu.memory_space<vmem>>, vector<64x1xf32>
    %3 = vector.broadcast %2 : vector<64x1xf32> to vector<64x256xf32>
    %4 = arith.mulf %1, %3 : vector<64x256xf32>
    %c0_4 = arith.constant 0 : index
    %c0_5 = arith.constant 0 : index
    %c0_6 = arith.constant 0 : index
    %5 = vector.load %arg5[%c0_4, %c0_5, %c0_6] : memref<1x64x256xf32, #tpu.memory_space<vmem>>, vector<1x64x256xf32>
    %6 = vector.shape_cast %5 : vector<1x64x256xf32> to vector<64x256xf32>
    %7 = vector.shape_cast %4 : vector<64x256xf32> to vector<1x64x256xf32>
    tpu.vector_store %arg5[%c0_4, %c0_5, %c0_6], %7 {strides = array<i32>} : memref<1x64x256xf32, #tpu.memory_space<vmem>>, vector<1x64x256xf32>,
    return
  }
  func.func @transform_0(%arg0: i32, %arg1: i32, %arg2: i32) -> (i32, i32, i32) {
    %c0_i32 = arith.constant 0 : i32
    return %arg0, %arg1, %arg2 : i32, i32, i32
  }
  func.func @transform_1(%arg0: i32, %arg1: i32, %arg2: i32) -> (i32, i32) {
    %c0_i32 = arith.constant 0 : i32
    %c0_i32_0 = arith.constant 0 : i32
    return %arg1, %c0_i32 : i32, i32
  }
  func.func @transform_2(%arg0: i32, %arg1: i32, %arg2: i32) -> (i32, i32, i32) {
    %c0_i32 = arith.constant 0 : i32
    return %arg0, %arg1, %arg2 : i32, i32, i32
  }
}

</mosaic_0001>

<bundles_post_ra>
// kernel: ca_layer.1
= control target key start
LH: loop header
LB: loop body
LE: loop exit
PB: predicated region body
PF: predicated region fallthrough
CT: control target
= control target key end

     0   :  { %s551_s9 = smov 0   ;;  %s553_s10 = smov 0   ;;  %s648_s0 = inlined_call_operand.vmem [shape: f32[2,64,256], index: 0, kind: input, shape index: {}]   ;;  %s649_s1 = inlined_call_operand.vmem [shape: f32[64,1], index: 1, kind: input, shape index: {}]   ;;  %s650_s2 = inlined_call_operand.vmem [shape: f32[2,64,256], index: 2, kind: output, shape index: {}]  }
   0x1   :  { %s555_s11 = smov 0  }
   0x2 LB: > { %s31_s12 = sadd.s32 1, %s529_s10  ;;  %p475_p0 = scmp.ge.s32.totalorder %s533_s11, 1  ;;  %s533_s11 = sphi %s555_s11, %s12_s11   ;;  %s529_s10 = sphi %s553_s10, %s652_s10   ;;  %s525_s9 = sphi %s551_s9, %s651_s9  }
   0x3   : > { %p33_p1 = scmp.ge.s32.totalorder %s31_s12, 2  ;;  %p161_p2 = scmp.lt.s32.totalorder %s533_s11, 3 }
   0x5   : > { %s654_s12 = smov (%p33_p1, %s31_s12), 0  ;;  %p162_p3 = pnand %p475_p0, %p161_p2 }
   0x6   : > { %p208_p4 = scmp.lt.s32.totalorder (!%p162_p3), %s525_s9, 1 }
   0x7   : > { %165 = sbr.rel (%p162_p3) target bundleno = 154 (0x9a), region = 28 }
   0xc   : > { %v262_v0 = vld [vmem:[%s649_s1 + $0x10] sm:$0xff]  ;;  %v260_v1 = vld [vmem:[%s649_s1] sm:$0xff]  ;;  %v535_v2 = vmov 0   ;;  %v263_v3 = vld [vmem:[%s649_s1 + $0x18] sm:$0xff]  ;;  %s656_s9 = smov (!%p208_p4, %s525_s9), 1 }
   0xd   : > { %510 = vset.pattern.permute.xlu1 %v535_v2  ;;  %509 = vset.pattern.permute.xlu0 %v535_v2  ;;  %v261_v4 = vld [vmem:[%s649_s1 + $0x8] sm:$0xff]  ;;  %v264_v6 = vld [vmem:[%s649_s1 + $0x20] sm:$0xff]  ;;  %v267_v7 = vld [vmem:[%s649_s1 + $0x38] sm:$0xff]  ;;  %s482_s29 = sshll.u32 %s656_s9, 7 }
   0xe   : > { %280 = vperm.xlu1 %510, %v262_v0   ;;  %270 = vperm.xlu0 %509, %v260_v1   ;;  %v265_v5 = vld [vmem:[%s649_s1 + $0x28] sm:$0xff]  ;;  %v266_v8 = vld [vmem:[%s649_s1 + $0x30] sm:$0xff]  ;;  %s600_s4 = scalar_lea.vmem %s648_s0, %s482_s29  ;;  %s609_s7 = scalar_lea.vmem %s650_s2, %s482_s29 }
   0xf   : > { %v248_v9 = vld [vmem:[%s600_s4 + $0x20] sm:$0xff]  ;;  %v249_v10 = vld [vmem:[%s600_s4 + $0x28] sm:$0xff]  ;;  %v250_v19 = vld [vmem:[%s600_s4 + $0x30] sm:$0xff] }
  0x10   : > { %v244_v11 = vld [vmem:[%s600_s4] sm:$0xff]  ;;  %v245_v12 = vld [vmem:[%s600_s4 + $0x8] sm:$0xff]  ;;  %v251_v20 = vld [vmem:[%s600_s4 + $0x38] sm:$0xff] }
  0x11   : > { %v246_v21 = vld [vmem:[%s600_s4 + $0x10] sm:$0xff]  ;;  %v247_v22 = vld [vmem:[%s600_s4 + $0x18] sm:$0xff]  ;;  %v252_v31 = vld [vmem:[%s600_s4 + $0x40] sm:$0xff] }
  0x12   : > { %285 = vperm.xlu1 %510, %v263_v3   ;;  %275 = vperm.xlu0 %509, %v261_v4   ;;  %v254_v29 = vld [vmem:[%s600_s4 + $0x50] sm:$0xff]  ;;  %v255_v30 = vld [vmem:[%s600_s4 + $0x58] sm:$0xff]  ;;  %v253_v32 = vld [vmem:[%s600_s4 + $0x48] sm:$0xff] }
  0x13   : > { %v258_v39 = vld [vmem:[%s600_s4 + $0x70] sm:$0xff]  ;;  %v259_v40 = vld [vmem:[%s600_s4 + $0x78] sm:$0xff]  ;;  %v256_v41 = vld [vmem:[%s600_s4 + $0x60] sm:$0xff] }
  0x14   : > { %v257_v42 = vld [vmem:[%s600_s4 + $0x68] sm:$0xff] }
  0x16   : > { %295 = vperm.xlu1 %510, %v265_v5   ;;  %290 = vperm.xlu0 %509, %v264_v6  }
  0x1a   : > { %305 = vperm.xlu1 %510, %v267_v7   ;;  %300 = vperm.xlu0 %509, %v266_v8  }
  0x89   : > { %v281_v13 = vpop.permute.xlu1 %280  ;;  %v271_v14 = vpop.permute.xlu0 %270 }
  0x8a   : > { %v312_v15 = vmul.f32 %v281_v13, %v248_v9  ;;  %v313_v16 = vmul.f32 %v281_v13, %v249_v10  ;;  %v308_v17 = vmul.f32 %v271_v14, %v244_v11  ;;  %v309_v18 = vmul.f32 %v271_v14, %v245_v12 }
  0x8c   : > { %328 = vst [vmem:[%s609_s7 + $0x20] sm:$0xff] %v312_v15  ;;  %329 = vst [vmem:[%s609_s7 + $0x28] sm:$0xff] %v313_v16 }
  0x8d   : > { %324 = vst [vmem:[%s609_s7] sm:$0xff] %v308_v17  ;;  %325 = vst [vmem:[%s609_s7 + $0x8] sm:$0xff] %v309_v18  ;;  %v286_v23 = vpop.permute.xlu1 %285  ;;  %v276_v24 = vpop.permute.xlu0 %275 }
  0x8e   : > { %v314_v25 = vmul.f32 %v286_v23, %v250_v19  ;;  %v315_v26 = vmul.f32 %v286_v23, %v251_v20  ;;  %v310_v27 = vmul.f32 %v276_v24, %v246_v21  ;;  %v311_v28 = vmul.f32 %v276_v24, %v247_v22 }
  0x90   : > { %330 = vst [vmem:[%s609_s7 + $0x30] sm:$0xff] %v314_v25  ;;  %331 = vst [vmem:[%s609_s7 + $0x38] sm:$0xff] %v315_v26 }
  0x91   : > { %326 = vst [vmem:[%s609_s7 + $0x10] sm:$0xff] %v310_v27  ;;  %327 = vst [vmem:[%s609_s7 + $0x18] sm:$0xff] %v311_v28  ;;  %v296_v33 = vpop.permute.xlu1 %295  ;;  %v291_v34 = vpop.permute.xlu0 %290 }
  0x92   : > { %v318_v35 = vmul.f32 %v296_v33, %v254_v29  ;;  %v319_v36 = vmul.f32 %v296_v33, %v255_v30  ;;  %v316_v37 = vmul.f32 %v291_v34, %v252_v31  ;;  %v317_v38 = vmul.f32 %v291_v34, %v253_v32 }
  0x94   : > { %334 = vst [vmem:[%s609_s7 + $0x50] sm:$0xff] %v318_v35  ;;  %335 = vst [vmem:[%s609_s7 + $0x58] sm:$0xff] %v319_v36 }
  0x95   : > { %332 = vst [vmem:[%s609_s7 + $0x40] sm:$0xff] %v316_v37  ;;  %333 = vst [vmem:[%s609_s7 + $0x48] sm:$0xff] %v317_v38  ;;  %v306_v43 = vpop.permute.xlu1 %305  ;;  %v301_v44 = vpop.permute.xlu0 %300 }
  0x96   : > { %v322_v45 = vmul.f32 %v306_v43, %v258_v39  ;;  %v323_v46 = vmul.f32 %v306_v43, %v259_v40  ;;  %v320_v47 = vmul.f32 %v301_v44, %v256_v41  ;;  %v321_v48 = vmul.f32 %v301_v44, %v257_v42 }
  0x98   : > { %338 = vst [vmem:[%s609_s7 + $0x70] sm:$0xff] %v322_v45  ;;  %339 = vst [vmem:[%s609_s7 + $0x78] sm:$0xff] %v323_v46 }
  0x99   : > { %336 = vst [vmem:[%s609_s7 + $0x60] sm:$0xff] %v320_v47  ;;  %337 = vst [vmem:[%s609_s7 + $0x68] sm:$0xff] %v321_v48 }
  0x9a PF: > { %s12_s11 = sadd.s32 1, %s533_s11   ;;  %s651_s9 = smov %s529_s10 }
  0x9b   : > { %p9_p5 = scmp.ge.s32.totalorder %s12_s11, 4   ;;  %s652_s10 = smov %s654_s12 }
  0x9d   :  { %11 = sbr.rel (!%p9_p5) target bundleno = 2 (0x2), region = 61 }

</bundles_post_ra>
